<compile_context>
chip_gen: v7x
topology: tpu7x:2x2x1
jax: 0.10.0
libtpu: 0.0.40
codegen_flags: <defaults>
</compile_context>

<pallas_src>
import functools

import jax
import jax.numpy as jnp
from jax import lax
from jax.experimental import pallas as pl
from jax.experimental.pallas import tpu as pltpu
import numpy as np

DECAY = 0.9
THRESHOLD = 1.0

SUB = 8  # time steps processed per inner block (= one f32 (8, 128) sublane tile)


def _round_up(x, m):
    return ((x + m - 1) // m) * m


def _snn_kernel(spikes_ref, w_ref, out_ref, psp_ref, v_ref, *, t_tile):
    """Grid = (neuron_tile j [parallel], time_tile t [arbitrary/serial]).

    spikes_ref: (t_tile, N_in_p) f32      w_ref:   (N_in_p, tn) f32
    out_ref:    (t_tile, tn)     f32      psp_ref: VMEM (t_tile, tn) f32
    v_ref:      VMEM (1, tn) f32  -- membrane potential carried across time tiles.
    """
    # Reset membrane potential at the first time tile of each neuron tile.
    @pl.when(pl.program_id(1) == 0)
    def _():
        v_ref[...] = jnp.zeros_like(v_ref)

    # --- SynapseLayer: masked dense projection for this block (MXU) ---
    psp_ref[...] = jnp.dot(
        spikes_ref[...], w_ref[...], preferred_element_type=jnp.float32
    )

    # --- SpikingNeuronLayer: sequential LIF recurrence, 8 steps per iteration ---
    def block(b, carry):
        base = pl.multiple_of(b * SUB, SUB)
        psp_blk = psp_ref[pl.ds(base, SUB), :]          # aligned full-tile load (SUB, tn)
        v = v_ref[...]                                  # (1, tn)
        rows = []
        for i in range(SUB):                            # static -> fully unrolled
            v = v * DECAY + psp_blk[i : i + 1, :]
            s = (v >= THRESHOLD).astype(jnp.float32)
            v = v * (1.0 - s)
            rows.append(s)
        v_ref[...] = v
        # one unmasked (SUB, tn) store per 8 steps
        out_ref[pl.ds(base, SUB), :] = jnp.concatenate(rows, axis=0)
        return carry

    lax.fori_loop(0, t_tile // SUB, block, 0)


def snn_forward(input_spikes, weight, *, t_tile=None, n_out_tile=None):
    """input_spikes: (T, N_in) f32 spike raster, weight: (N_in, N_out) f32.
    Returns (T, N_out) f32 output spike raster."""
    T, n_in = input_spikes.shape
    n_in_w, n_out = weight.shape
    assert n_in == n_in_w

    # --- tile choices (sublane multiple of 8, lane multiple of 128) ---
    if t_tile is None:
        t_tile = min(256, _round_up(T, SUB))
    t_tile = _round_up(t_tile, SUB)
    if n_out_tile is None:
        n_out_tile = min(512, _round_up(n_out, 128))
    n_out_tile = _round_up(n_out_tile, 128)

    T_p = _round_up(T, t_tile)
    n_out_p = _round_up(n_out, n_out_tile)
    n_in_p = _round_up(n_in, 128)
    # TODO(synk): also tile the contraction (N_in) axis if N_in is very large.

    spikes_p = (
        jnp.zeros((T_p, n_in_p), jnp.float32)
        .at[:T, :n_in]
        .set(input_spikes.astype(jnp.float32))
    )
    w_p = (
        jnp.zeros((n_in_p, n_out_p), jnp.float32)
        .at[:n_in, :n_out]
        .set(weight.astype(jnp.float32))
    )

    grid = (n_out_p // n_out_tile, T_p // t_tile)

    # Per-iteration VMEM footprint (double-buffered inputs/outputs + scratch).
    vmem_bytes = (
        2 * t_tile * n_in_p * 4        # spikes double-buffer
        + 2 * n_in_p * n_out_tile * 4  # weight double-buffer
        + 2 * t_tile * n_out_tile * 4  # output double-buffer
        + t_tile * n_out_tile * 4      # psp scratch
        + n_out_tile * 4               # v carry
    )
    vmem_limit = int(min(max(2 * vmem_bytes, 16 * 1024 * 1024), 48 * 1024 * 1024))

    kernel = functools.partial(_snn_kernel, t_tile=t_tile)

    out_p = pl.pallas_call(
        kernel,
        out_shape=jax.ShapeDtypeStruct((T_p, n_out_p), jnp.float32),
        grid_spec=pltpu.PrefetchScalarGridSpec(
            num_scalar_prefetch=0,
            grid=grid,
            in_specs=[
                pl.BlockSpec((t_tile, n_in_p), lambda j, t: (t, 0)),
                pl.BlockSpec((n_in_p, n_out_tile), lambda j, t: (0, j)),
            ],
            out_specs=pl.BlockSpec((t_tile, n_out_tile), lambda j, t: (t, j)),
            scratch_shapes=[
                pltpu.VMEM((t_tile, n_out_tile), jnp.float32),  # psp block
                pltpu.VMEM((1, n_out_tile), jnp.float32),       # membrane potential
            ],
        ),
        compiler_params=pltpu.CompilerParams(
            dimension_semantics=("parallel", "arbitrary"),
            vmem_limit_bytes=vmem_limit,
        ),
    )(spikes_p, w_p)

    return out_p[:T, :n_out]


def snn_reference(input_spikes, weight):
    """Pure-JAX reference of the same forward pass."""
    psp = input_spikes @ weight

    def step(v, x_t):
        v = DECAY * v + x_t
        s = (v >= THRESHOLD).astype(jnp.float32)
        v = v * (1.0 - s)
        return v, s

    _, spikes = lax.scan(step, jnp.zeros((weight.shape[1],), jnp.float32), psp)
    return spikes


if __name__ == "__main__":
    # Module defaults: num_input_neurons=10, num_output_neurons=100, conn_prob=0.5
    num_input_neurons = 10
    num_output_neurons = 100
    conn_prob = 0.5
    num_steps = 8  # spike-raster length (time axis)

    key = jax.random.PRNGKey(0)
    k_w, k_mask, k_in = jax.random.split(key, 3)

    # SynapseLayer init: uniform weights masked by Bernoulli(conn_prob) connectivity.
    w = jax.random.uniform(k_w, (num_input_neurons, num_output_neurons), jnp.float32)
    mask = (
        jax.random.uniform(k_mask, (num_input_neurons, num_output_neurons)) < conn_prob
    ).astype(jnp.float32)
    weight = w * mask

    # Input spike raster: (T, N_in) of {0,1}.
    input_spikes = (
        jax.random.uniform(k_in, (num_steps, num_input_neurons)) < 0.3
    ).astype(jnp.float32)

    out = snn_forward(input_spikes, weight)
    out = jax.block_until_ready(out)

    ref = jax.block_until_ready(snn_reference(input_spikes, weight))
    np.testing.assert_allclose(np.asarray(out), np.asarray(ref), rtol=1e-6, atol=1e-6)

    assert out.shape == (num_steps, num_output_neurons)
    print("KERNEL_OK")
</pallas_src>

<mosaic_0001>
module attributes {stable_mosaic.version = 11 : i64} {
  func.func @_snn_kernel(%arg0: i32, %arg1: i32, %arg2: memref<8x128xf32, #tpu.memory_space<vmem>>, %arg3: memref<128x128xf32, #tpu.memory_space<vmem>>, %arg4: memref<8x128xf32, #tpu.memory_space<vmem>>, %arg5: memref<8x128xf32, #tpu.memory_space<vmem>>, %arg6: memref<1x128xf32, #tpu.memory_space<vmem>>) attributes {dimension_semantics = [#tpu.dimension_semantics<parallel>, #tpu.dimension_semantics<arbitrary>], iteration_bounds = array<i64: 1, 1>, scalar_prefetch = 0 : i64, scratch_operands = 2 : i64, tpu.core_type = #tpu.core_type<tc>, window_params = [{transform_indices = @transform_0, window_bounds = array<i64: 8, 128>}, {transform_indices = @transform_1, window_bounds = array<i64: 128, 128>}, {transform_indices = @transform_2, window_bounds = array<i64: 8, 128>}]} {
    %c0_i32 = arith.constant 0 : i32
    %0 = arith.cmpi eq, %arg1, %c0_i32 : i32
    %1 = arith.extui %0 : i1 to i32
    %c0_i32_0 = arith.constant 0 : i32
    %2 = arith.cmpi ne, %1, %c0_i32_0 : i32
    scf.if %2 {
      %cst_37 = arith.constant 0.000000e+00 : f32
      %104 = vector.broadcast %cst_37 : f32 to vector<1x128xf32>
      %c0_38 = arith.constant 0 : index
      %c0_39 = arith.constant 0 : index
      %105 = vector.load %arg6[%c0_38, %c0_39] : memref<1x128xf32, #tpu.memory_space<vmem>>, vector<1x128xf32>
      tpu.vector_store %arg6[%c0_38, %c0_39], %104 {strides = array<i32>} : memref<1x128xf32, #tpu.memory_space<vmem>>, vector<1x128xf32>,
    } else {
    }
    %c0 = arith.constant 0 : index
    %c0_1 = arith.constant 0 : index
    %3 = vector.load %arg2[%c0, %c0_1] : memref<8x128xf32, #tpu.memory_space<vmem>>, vector<8x128xf32>
    %c0_2 = arith.constant 0 : index
    %c0_3 = arith.constant 0 : index
    %4 = vector.load %arg3[%c0_2, %c0_3] : memref<128x128xf32, #tpu.memory_space<vmem>>, vector<128x128xf32>
    %cst = arith.constant dense<0.000000e+00> : vector<8x128xf32>
    %5 = tpu.matmul %3, %4, %cst {dimension_numbers = #tpu.dot_dimension_numbers<[1], [0], [0], [1], [0, 0, 1, 1], [], []>} : vector<8x128xf32>, vector<128x128xf32>, vector<8x128xf32> -> vector<8x128xf32>
    %c0_4 = arith.constant 0 : index
    %c0_5 = arith.constant 0 : index
    %6 = vector.load %arg5[%c0_4, %c0_5] : memref<8x128xf32, #tpu.memory_space<vmem>>, vector<8x128xf32>
    tpu.vector_store %arg5[%c0_4, %c0_5], %5 {strides = array<i32>} : memref<8x128xf32, #tpu.memory_space<vmem>>, vector<8x128xf32>,
    %c0_i32_6 = arith.constant 0 : i32
    %c8_i32 = arith.constant 8 : i32
    %7 = arith.muli %c0_i32_6, %c8_i32 : i32
    %8 = tpu.assume_multiple %7, 8 : i32
    %9 = arith.index_cast %8 : i32 to index
    %c0_7 = arith.constant 0 : index
    %10 = vector.load %arg5[%9, %c0_7] : memref<8x128xf32, #tpu.memory_space<vmem>>, vector<8x128xf32>
    %c0_8 = arith.constant 0 : index
    %c0_9 = arith.constant 0 : index
    %11 = vector.load %arg6[%c0_8, %c0_9] : memref<1x128xf32, #tpu.memory_space<vmem>>, vector<1x128xf32>
    %cst_10 = arith.constant 0.899999976 : f32
    %12 = vector.broadcast %cst_10 : f32 to vector<1x128xf32>
    %13 = arith.mulf %11, %12 : vector<1x128xf32>
    %14 = vector.extract_strided_slice %10 {offsets = [0, 0], sizes = [1, 128], strides = [1, 1]} : vector<8x128xf32> to vector<1x128xf32>
    %15 = arith.addf %13, %14 : vector<1x128xf32>
    %cst_11 = arith.constant 1.000000e+00 : f32
    %16 = vector.broadcast %cst_11 : f32 to vector<1x128xf32>
    %17 = arith.cmpf oge, %15, %16 : vector<1x128xf32>
    %18 = arith.extui %17 : vector<1x128xi1> to vector<1x128xi32>
    %19 = arith.sitofp %18 : vector<1x128xi32> to vector<1x128xf32>
    %cst_12 = arith.constant 1.000000e+00 : f32
    %20 = vector.broadcast %cst_12 : f32 to vector<1x128xf32>
    %21 = arith.subf %20, %19 : vector<1x128xf32>
    %22 = arith.mulf %15, %21 : vector<1x128xf32>
    %cst_13 = arith.constant 0.899999976 : f32
    %23 = vector.broadcast %cst_13 : f32 to vector<1x128xf32>
    %24 = arith.mulf %22, %23 : vector<1x128xf32>
    %25 = vector.extract_strided_slice %10 {offsets = [1, 0], sizes = [1, 128], strides = [1, 1]} : vector<8x128xf32> to vector<1x128xf32>
    %26 = arith.addf %24, %25 : vector<1x128xf32>
    %cst_14 = arith.constant 1.000000e+00 : f32
    %27 = vector.broadcast %cst_14 : f32 to vector<1x128xf32>
    %28 = arith.cmpf oge, %26, %27 : vector<1x128xf32>
    %29 = arith.extui %28 : vector<1x128xi1> to vector<1x128xi32>
    %30 = arith.sitofp %29 : vector<1x128xi32> to vector<1x128xf32>
    %cst_15 = arith.constant 1.000000e+00 : f32
    %31 = vector.broadcast %cst_15 : f32 to vector<1x128xf32>
    %32 = arith.subf %31, %30 : vector<1x128xf32>
    %33 = arith.mulf %26, %32 : vector<1x128xf32>
    %cst_16 = arith.constant 0.899999976 : f32
    %34 = vector.broadcast %cst_16 : f32 to vector<1x128xf32>
    %35 = arith.mulf %33, %34 : vector<1x128xf32>
    %36 = vector.extract_strided_slice %10 {offsets = [2, 0], sizes = [1, 128], strides = [1, 1]} : vector<8x128xf32> to vector<1x128xf32>
    %37 = arith.addf %35, %36 : vector<1x128xf32>
    %cst_17 = arith.constant 1.000000e+00 : f32
    %38 = vector.broadcast %cst_17 : f32 to vector<1x128xf32>
    %39 = arith.cmpf oge, %37, %38 : vector<1x128xf32>
    %40 = arith.extui %39 : vector<1x128xi1> to vector<1x128xi32>
    %41 = arith.sitofp %40 : vector<1x128xi32> to vector<1x128xf32>
    %cst_18 = arith.constant 1.000000e+00 : f32
    %42 = vector.broadcast %cst_18 : f32 to vector<1x128xf32>
    %43 = arith.subf %42, %41 : vector<1x128xf32>
    %44 = arith.mulf %37, %43 : vector<1x128xf32>
    %cst_19 = arith.constant 0.899999976 : f32
    %45 = vector.broadcast %cst_19 : f32 to vector<1x128xf32>
    %46 = arith.mulf %44, %45 : vector<1x128xf32>
    %47 = vector.extract_strided_slice %10 {offsets = [3, 0], sizes = [1, 128], strides = [1, 1]} : vector<8x128xf32> to vector<1x128xf32>
    %48 = arith.addf %46, %47 : vector<1x128xf32>
    %cst_20 = arith.constant 1.000000e+00 : f32
    %49 = vector.broadcast %cst_20 : f32 to vector<1x128xf32>
    %50 = arith.cmpf oge, %48, %49 : vector<1x128xf32>
    %51 = arith.extui %50 : vector<1x128xi1> to vector<1x128xi32>
    %52 = arith.sitofp %51 : vector<1x128xi32> to vector<1x128xf32>
    %cst_21 = arith.constant 1.000000e+00 : f32
    %53 = vector.broadcast %cst_21 : f32 to vector<1x128xf32>
    %54 = arith.subf %53, %52 : vector<1x128xf32>
    %55 = arith.mulf %48, %54 : vector<1x128xf32>
    %cst_22 = arith.constant 0.899999976 : f32
    %56 = vector.broadcast %cst_22 : f32 to vector<1x128xf32>
    %57 = arith.mulf %55, %56 : vector<1x128xf32>
    %58 = vector.extract_strided_slice %10 {offsets = [4, 0], sizes = [1, 128], strides = [1, 1]} : vector<8x128xf32> to vector<1x128xf32>
    %59 = arith.addf %57, %58 : vector<1x128xf32>
    %cst_23 = arith.constant 1.000000e+00 : f32
    %60 = vector.broadcast %cst_23 : f32 to vector<1x128xf32>
    %61 = arith.cmpf oge, %59, %60 : vector<1x128xf32>
    %62 = arith.extui %61 : vector<1x128xi1> to vector<1x128xi32>
    %63 = arith.sitofp %62 : vector<1x128xi32> to vector<1x128xf32>
    %cst_24 = arith.constant 1.000000e+00 : f32
    %64 = vector.broadcast %cst_24 : f32 to vector<1x128xf32>
    %65 = arith.subf %64, %63 : vector<1x128xf32>
    %66 = arith.mulf %59, %65 : vector<1x128xf32>
    %cst_25 = arith.constant 0.899999976 : f32
    %67 = vector.broadcast %cst_25 : f32 to vector<1x128xf32>
    %68 = arith.mulf %66, %67 : vector<1x128xf32>
    %69 = vector.extract_strided_slice %10 {offsets = [5, 0], sizes = [1, 128], strides = [1, 1]} : vector<8x128xf32> to vector<1x128xf32>
    %70 = arith.addf %68, %69 : vector<1x128xf32>
    %cst_26 = arith.constant 1.000000e+00 : f32
    %71 = vector.broadcast %cst_26 : f32 to vector<1x128xf32>
    %72 = arith.cmpf oge, %70, %71 : vector<1x128xf32>
    %73 = arith.extui %72 : vector<1x128xi1> to vector<1x128xi32>
    %74 = arith.sitofp %73 : vector<1x128xi32> to vector<1x128xf32>
    %cst_27 = arith.constant 1.000000e+00 : f32
    %75 = vector.broadcast %cst_27 : f32 to vector<1x128xf32>
    %76 = arith.subf %75, %74 : vector<1x128xf32>
    %77 = arith.mulf %70, %76 : vector<1x128xf32>
    %cst_28 = arith.constant 0.899999976 : f32
    %78 = vector.broadcast %cst_28 : f32 to vector<1x128xf32>
    %79 = arith.mulf %77, %78 : vector<1x128xf32>
    %80 = vector.extract_strided_slice %10 {offsets = [6, 0], sizes = [1, 128], strides = [1, 1]} : vector<8x128xf32> to vector<1x128xf32>
    %81 = arith.addf %79, %80 : vector<1x128xf32>
    %cst_29 = arith.constant 1.000000e+00 : f32
    %82 = vector.broadcast %cst_29 : f32 to vector<1x128xf32>
    %83 = arith.cmpf oge, %81, %82 : vector<1x128xf32>
    %84 = arith.extui %83 : vector<1x128xi1> to vector<1x128xi32>
    %85 = arith.sitofp %84 : vector<1x128xi32> to vector<1x128xf32>
    %cst_30 = arith.constant 1.000000e+00 : f32
    %86 = vector.broadcast %cst_30 : f32 to vector<1x128xf32>
    %87 = arith.subf %86, %85 : vector<1x128xf32>
    %88 = arith.mulf %81, %87 : vector<1x128xf32>
    %cst_31 = arith.constant 0.899999976 : f32
    %89 = vector.broadcast %cst_31 : f32 to vector<1x128xf32>
    %90 = arith.mulf %88, %89 : vector<1x128xf32>
    %91 = vector.extract_strided_slice %10 {offsets = [7, 0], sizes = [1, 128], strides = [1, 1]} : vector<8x128xf32> to vector<1x128xf32>
    %92 = arith.addf %90, %91 : vector<1x128xf32>
    %cst_32 = arith.constant 1.000000e+00 : f32
    %93 = vector.broadcast %cst_32 : f32 to vector<1x128xf32>
    %94 = arith.cmpf oge, %92, %93 : vector<1x128xf32>
    %95 = arith.extui %94 : vector<1x128xi1> to vector<1x128xi32>
    %96 = arith.sitofp %95 : vector<1x128xi32> to vector<1x128xf32>
    %cst_33 = arith.constant 1.000000e+00 : f32
    %97 = vector.broadcast %cst_33 : f32 to vector<1x128xf32>
    %98 = arith.subf %97, %96 : vector<1x128xf32>
    %99 = arith.mulf %92, %98 : vector<1x128xf32>
    %c0_34 = arith.constant 0 : index
    %c0_35 = arith.constant 0 : index
    %100 = vector.load %arg6[%c0_34, %c0_35] : memref<1x128xf32, #tpu.memory_space<vmem>>, vector<1x128xf32>
    tpu.vector_store %arg6[%c0_34, %c0_35], %99 {strides = array<i32>} : memref<1x128xf32, #tpu.memory_space<vmem>>, vector<1x128xf32>,
    %101 = tpu.concatenate %19, %30, %41, %52, %63, %74, %85, %96 in 0 : vector<1x128xf32>, vector<1x128xf32>, vector<1x128xf32>, vector<1x128xf32>, vector<1x128xf32>, vector<1x128xf32>, vector<1x128xf32>, vector<1x128xf32> -> vector<8x128xf32>
    %102 = arith.index_cast %8 : i32 to index
    %c0_36 = arith.constant 0 : index
    %103 = vector.load %arg4[%102, %c0_36] : memref<8x128xf32, #tpu.memory_space<vmem>>, vector<8x128xf32>
    tpu.vector_store %arg4[%102, %c0_36], %101 {strides = array<i32>} : memref<8x128xf32, #tpu.memory_space<vmem>>, vector<8x128xf32>,
    %c1_i32 = arith.constant 1 : i32
    return
  }
  func.func @transform_0(%arg0: i32, %arg1: i32) -> (i32, i32) {
    %c0_i32 = arith.constant 0 : i32
    %c0_i32_0 = arith.constant 0 : i32
    return %arg1, %c0_i32 : i32, i32
  }
  func.func @transform_1(%arg0: i32, %arg1: i32) -> (i32, i32) {
    %c0_i32 = arith.constant 0 : i32
    %c0_i32_0 = arith.constant 0 : i32
    return %c0_i32, %arg0 : i32, i32
  }
  func.func @transform_2(%arg0: i32, %arg1: i32) -> (i32, i32) {
    %c0_i32 = arith.constant 0 : i32
    return %arg1, %arg0 : i32, i32
  }
}

</mosaic_0001>

<bundles_post_ra>
// kernel: tpu_custom_call.1
= control target key start
LH: loop header
LB: loop body
LE: loop exit
PB: predicated region body
PF: predicated region fallthrough
CT: control target
= control target key end

     0   :  { %7 = vsyncpa [#allocation5], 0  ;;  %s571_s0 = inlined_call_operand.hbm [shape: f32[8,128], index: 0, kind: input, shape index: {}]   ;;  %s572_s1 = inlined_call_operand.hbm [shape: f32[128,128], index: 1, kind: input, shape index: {}]   ;;  %s573_s2 = inlined_call_operand.hbm [shape: f32[8,128], index: 2, kind: output, shape index: {}]  }
   0x1   :  { %8 = vsyncpa [#allocation8], 0 }
   0x2   :  { %9 = vsyncpa [#allocation6], 0  ;;  %s485_s9 = smov [#allocation4]   ;;  %s486_s11 = smov [#allocation7]  }
   0x3   :  { %s16_s10 = sshll.u32 %s485_s9, 4  ;;  %s25_s12 = sshll.u32 %s486_s11, 4  ;;  %s17_s10 = int_to_ptr.vmem [resolvable:$true] %s16_s10  ;;  %s509_s12 = int_to_ptr.vmem [resolvable:$true] %s25_s12 }
   0x4   :  { %s413_s15 = scalar_lea.hbm %s571_s0, 128 }
   0x5   :  { %p414_p0 = scmp.ne.s32.totalorder %s571_s0, %s413_s15  ;;  %p417_p1 = scmp.lt.u32.totalorder %s413_s15, %s571_s0 }
   0x7   :  { %p419_p2 = pnand %p417_p1, %p414_p0 }
   0x9   :  { %422 = shalt.err (!%p419_p2)
}
   0xa   :  { %s423_s20 = scalar_lea.vmem %s17_s10, 128  ;;  %p428_p4 = scmp.lt.s32.totalorder %s17_s10, %s17_s10 }
   0xb   :  { %p424_p3 = scmp.ne.s32.totalorder %s17_s10, %s423_s20  ;;  %p429_p5 = scmp.lt.s32.totalorder %s423_s20, %s423_s20 }
   0xd   :  { %p430_p6 = por %p429_p5, %p428_p4 }
   0xf   :  { %p431_p7 = pnand %p430_p6, %p424_p3 }
  0x11   :  { %434 = shalt.err (!%p431_p7)
}
  0x12   :  { %19 = dma.hbm_to_vmem [thread:$0]  %s571_s0, 128, %s17_s10, [#allocation5]  }
  0x13   :  { %s435_s25 = scalar_lea.hbm %s572_s1, 2048 }
  0x14   :  { %p436_p8 = scmp.ne.s32.totalorder %s572_s1, %s435_s25  ;;  %p439_p9 = scmp.lt.u32.totalorder %s435_s25, %s572_s1 }
  0x16   :  { %p441_p10 = pnand %p439_p9, %p436_p8 }
  0x18   :  { %444 = shalt.err (!%p441_p10)
}
  0x19   :  { %s445_s30 = scalar_lea.vmem %s509_s12, 2048  ;;  %p450_p12 = scmp.lt.s32.totalorder %s509_s12, %s509_s12 }
  0x1a   :  { %p446_p11 = scmp.ne.s32.totalorder %s509_s12, %s445_s30  ;;  %p451_p13 = scmp.lt.s32.totalorder %s445_s30, %s445_s30 }
  0x1c   :  { %p452_p0 = por %p451_p13, %p450_p12 }
  0x1e   :  { %p453_p1 = pnand %p452_p0, %p446_p11 }
  0x20   :  { %456 = shalt.err (!%p453_p1)
}
  0x21   :  { %s487_s0 = smov 128   ;;  %s488_s3 = smov 8  }
  0x22   :  { %31 = dma.hbm_to_vmem [thread:$0]  %s572_s1, 2048, %s509_s12, [#allocation8], %s487_s0, %s487_s0, %s488_s3  }
  0x23   :  { %479 = dma.done.wait [#allocation5], 128  }
  0x24   :  { %480 = vsyncadd [#allocation5], 4294967168 }
  0x25   :  { %481 = dma.done.wait [#allocation8], 2048  }
  0x26   :  { %482 = vsyncadd [#allocation8], 4294965248  ;;  %v489_v0 = vmov 0.0|0.0   ;;  %vm490_vm0 = vmmov 0   ;;  %v491_v1 = vmov 0.0   ;;  %v44_v2 = vld [vmem:[#allocation7] sm:$0xff]  ;;  %v145_v29 = vlaneseq }
  0x27   :  { %380 = vmatprep.subr.bf16.mxu0 %v489_v0  ;;  %377 = vmatprep.mubr.msk.f32.mxu0 %vm490_vm0, %v491_v1  ;;  %42 = vst [vmem:[#allocation3] sm:$0x1] %v491_v1  ;;  %v45_v3 = vld [vmem:[#allocation7 + $0x8] sm:$0xff]  ;;  %v46_v4 = vld [vmem:[#allocation7 + $0x10] sm:$0xff]  ;;  %v47_v6 = vld [vmem:[#allocation7 + $0x18] sm:$0xff]  ;;  %vm289_vm3 = vcmask 1040384  }
  0x28   :  { %v381_v5 = vpack.c.bf16 %v45_v3, %v44_v2  ;;  %v384_v7 = vpack.c.bf16 %v47_v6, %v46_v4  ;;  %v48_v8 = vld [vmem:[#allocation7 + $0x20] sm:$0xff]  ;;  %v49_v9 = vld [vmem:[#allocation7 + $0x28] sm:$0xff]  ;;  %v50_v11 = vld [vmem:[#allocation7 + $0x30] sm:$0xff]  ;;  %v492_v27 = vmov 1966171168   ;;  %v146_v31 = vshrl.u32 %v145_v29, 7 }
  0x29   :  { %v387_v10 = vpack.c.bf16 %v49_v9, %v48_v8  ;;  %v51_v12 = vld [vmem:[#allocation7 + $0x38] sm:$0xff]  ;;  %v52_v14 = vld [vmem:[#allocation7 + $0x40] sm:$0xff]  ;;  %v53_v15 = vld [vmem:[#allocation7 + $0x48] sm:$0xff]  ;;  %v143_v28 = vunpack.c.l.s4 %v492_v27  ;;  %vm291_vm5 = vcmask 1041408   ;;  %vm293_vm7 = vcmask 1042432   ;;  %s493_s1 = smov [#allocation9]  }
  0x2a   :  { %382 = vmatpush3.bf16.msra.mxu0 %v381_v5  ;;  %v390_v13 = vpack.c.bf16 %v51_v12, %v50_v11  ;;  %v393_v16 = vpack.c.bf16 %v53_v15, %v52_v14  ;;  %v54_v17 = vld [vmem:[#allocation7 + $0x50] sm:$0xff]  ;;  %v55_v18 = vld [vmem:[#allocation7 + $0x58] sm:$0xff]  ;;  %v56_v20 = vld [vmem:[#allocation7 + $0x60] sm:$0xff]  ;;  %v543_v46 = vsub.s32 0, %v146_v31  ;;  %vm295_vm9 = vcmask 1043456   ;;  %s310_s6 = sshll.u32 %s493_s1, 4  ;;  %s311_s6 = int_to_ptr.vmem [resolvable:$true] %s310_s6 }
  0x2b   :  { %383 = vmatprep.subr.bf16.mxu0 %v489_v0  ;;  %v396_v19 = vpack.c.bf16 %v55_v18, %v54_v17  ;;  %v57_v21 = vld [vmem:[#allocation7 + $0x68] sm:$0xff]  ;;  %v58_v23 = vld [vmem:[#allocation7 + $0x70] sm:$0xff]  ;;  %v59_v24 = vld [vmem:[#allocation7 + $0x78] sm:$0xff]  ;;  %v144_v30 = vunpack.c.0.s8 %v143_v28  ;;  %vm297_vm11 = vcmask 1044480   ;;  %vm299_vm13 = vcmask 1045504   ;;  %s457_s7 = scalar_lea.vmem %s311_s6, 128  ;;  %p462_p3 = scmp.lt.s32.totalorder %s311_s6, %s311_s6 }
  0x2c   :  { %v399_v22 = vpack.c.bf16 %v57_v21, %v56_v20  ;;  %v402_v25 = vpack.c.bf16 %v59_v24, %v58_v23  ;;  %v43_v26 = vld [vmem:[#allocation4] sm:$0xff]  ;;  %vm301_vm15 = vcmask 1046528   ;;  %p458_p2 = scmp.ne.s32.totalorder %s311_s6, %s457_s7  ;;  %p463_p4 = scmp.lt.s32.totalorder %s457_s7, %s457_s7 }
  0x2d   :  { %v147_v34 = vsub.s32 %v144_v30, %v146_v31 }
  0x2e   :  { %385 = vmatpush3.bf16.msra.mxu0 %v384_v7  ;;  %v132_v32 = vld [vmem:[#allocation3] sm:$0x1]  ;;  %p464_p5 = por %p463_p4, %p462_p3 }
  0x2f   :  { %386 = vmatprep.subr.bf16.mxu0 %v489_v0  ;;  %v133_v33 = vmul.f32 0.9, %v132_v32 }
  0x30   :  { %p465_p6 = pnand %p464_p5, %p458_p2 }
  0x32   :  { %388 = vmatpush3.bf16.msra.mxu0 %v387_v10 }
  0x33   :  { %389 = vmatprep.subr.bf16.mxu0 %v489_v0 }
  0x36   :  { %391 = vmatpush3.bf16.msra.mxu0 %v390_v13 }
  0x37   :  { %392 = vmatprep.subr.bf16.mxu0 %v489_v0 }
  0x3a   :  { %394 = vmatpush3.bf16.msra.mxu0 %v393_v16 }
  0x3b   :  { %395 = vmatprep.subr.bf16.mxu0 %v489_v0 }
  0x3e   :  { %397 = vmatpush3.bf16.msra.mxu0 %v396_v19 }
  0x3f   :  { %398 = vmatprep.subr.bf16.mxu0 %v489_v0 }
  0x42   :  { %400 = vmatpush3.bf16.msra.mxu0 %v399_v22 }
  0x43   :  { %401 = vmatprep.subr.bf16.mxu0 %v489_v0 }
  0x46   :  { %403 = vmatpush3.bf16.msra.mxu0 %v402_v25 }
  0x49   :  { %378 = vmatmul.mubr.f32.vlgmr.msra.gmra.mrb[0].mxu0 %v43_v26 }
 0x11c   :  { %v126_v35 = vpop.f32.mrb[0].mxu0 }
 0x11d   :  { %v134_v36 = vadd.f32 %v133_v33, %v126_v35  ;;  %v148_v37 = vrot.slane %v126_v35, %v147_v34  ;;  %v379_v38 = vpop.f32.mrb[1].mxu0  ;;  %v190_v0 = vcombine.high %v126_v35, %v126_v35 }
 0x11f   :  { %vm135_vm1 = vcmp.ge.f32.partialorder %v134_v36, 1.0  ;;  %v149_v41 = vcombine.high %v148_v37, %v148_v37  ;;  %v156_v48 = vrot.slane %v148_v37, %v147_v34  ;;  %v197_v4 = vrot.slane %v190_v0, %v147_v34 }
 0x120   :  { %v320_v39 = vsel %vm135_vm1, 1.0, %v491_v1 }
 0x121   :  { %v138_v40 = vsub.f32 1.0, %v320_v39  ;;  %v163_v44 = vrot.slane %v149_v41, %v147_v34  ;;  %v172_v54 = vcombine.high %v156_v48, %v156_v48  ;;  %v204_v9 = vrot.slane %v197_v4, %v147_v34 }
 0x122   :  { %v213_v13 = vcombine.high %v197_v4, %v197_v4 }
 0x123   :  { %v139_v42 = vmul.f32 %v138_v40, %v134_v36  ;;  %v181_v62 = vcombine.high %v163_v44, %v163_v44  ;;  %v229_v26 = vcombine.high %v204_v9, %v204_v9 }
 0x124   :  { %v220_v18 = vrot.slane %v213_v13, %v147_v34 }
 0x125   :  { %v140_v43 = vmul.f32 0.9, %v139_v42 }
 0x126   :  { %v238_v33 = vcombine.high %v220_v18, %v220_v18 }
 0x127   :  { %v165_v45 = vadd.f32 %v163_v44, %v140_v43 }
 0x129   :  { %vm166_vm2 = vcmp.ge.f32.partialorder %v165_v45, 1.0 }
 0x12a   :  { %v321_v47 = vsel %vm166_vm2, 1.0, %v491_v1 }
 0x12b   :  { %v169_v49 = vsub.f32 1.0, %v321_v47  ;;  %v251_v50 = vrot.slane %v321_v47, %v543_v46 }
 0x12d   :  { %v170_v51 = vmul.f32 %v169_v49, %v165_v45  ;;  %v290_v52 = vsel %vm289_vm3, %v320_v39, %v251_v50 }
 0x12f   :  { %v171_v53 = vmul.f32 0.9, %v170_v51 }
 0x131   :  { %v174_v55 = vadd.f32 %v172_v54, %v171_v53 }
 0x133   :  { %vm175_vm4 = vcmp.ge.f32.partialorder %v174_v55, 1.0 }
 0x134   :  { %v322_v56 = vsel %vm175_vm4, 1.0, %v491_v1 }
 0x135   :  { %v178_v57 = vsub.f32 1.0, %v322_v56  ;;  %v257_v58 = vrot.slane %v322_v56, %v543_v46 }
 0x137   :  { %v179_v59 = vmul.f32 %v178_v57, %v174_v55  ;;  %v292_v60 = vsel %vm291_vm5, %v290_v52, %v257_v58 }
 0x139   :  { %v180_v61 = vmul.f32 0.9, %v179_v59 }
 0x13b   :  { %v183_v63 = vadd.f32 %v181_v62, %v180_v61 }
 0x13d   :  { %vm184_vm6 = vcmp.ge.f32.partialorder %v183_v63, 1.0 }
 0x13e   :  { %v323_v2 = vsel %vm184_vm6, 1.0, %v491_v1 }
 0x13f   :  { %v187_v3 = vsub.f32 1.0, %v323_v2  ;;  %v263_v5 = vrot.slane %v323_v2, %v543_v46 }
 0x141   :  { %v188_v6 = vmul.f32 %v187_v3, %v183_v63  ;;  %v294_v7 = vsel %vm293_vm7, %v292_v60, %v263_v5 }
 0x143   :  { %v189_v8 = vmul.f32 0.9, %v188_v6 }
 0x145   :  { %v206_v10 = vadd.f32 %v204_v9, %v189_v8 }
 0x147   :  { %vm207_vm8 = vcmp.ge.f32.partialorder %v206_v10, 1.0 }
 0x148   :  { %v324_v11 = vsel %vm207_vm8, 1.0, %v491_v1 }
 0x149   :  { %v210_v12 = vsub.f32 1.0, %v324_v11  ;;  %v269_v14 = vrot.slane %v324_v11, %v543_v46 }
 0x14b   :  { %v211_v15 = vmul.f32 %v210_v12, %v206_v10  ;;  %v296_v16 = vsel %vm295_vm9, %v294_v7, %v269_v14 }
 0x14d   :  { %v212_v17 = vmul.f32 0.9, %v211_v15 }
 0x14f   :  { %v222_v19 = vadd.f32 %v220_v18, %v212_v17 }
 0x151   :  { %vm223_vm10 = vcmp.ge.f32.partialorder %v222_v19, 1.0 }
 0x152   :  { %v325_v20 = vsel %vm223_vm10, 1.0, %v491_v1 }
 0x153   :  { %v226_v21 = vsub.f32 1.0, %v325_v20  ;;  %v275_v22 = vrot.slane %v325_v20, %v543_v46 }
 0x155   :  { %v227_v23 = vmul.f32 %v226_v21, %v222_v19  ;;  %v298_v24 = vsel %vm297_vm11, %v296_v16, %v275_v22 }
 0x157   :  { %v228_v25 = vmul.f32 0.9, %v227_v23 }
 0x159   :  { %v231_v27 = vadd.f32 %v229_v26, %v228_v25 }
 0x15b   :  { %vm232_vm12 = vcmp.ge.f32.partialorder %v231_v27, 1.0 }
 0x15c   :  { %v326_v28 = vsel %vm232_vm12, 1.0, %v491_v1 }
 0x15d   :  { %v235_v29 = vsub.f32 1.0, %v326_v28  ;;  %v281_v30 = vrot.slane %v326_v28, %v543_v46 }
 0x15f   :  { %v236_v31 = vmul.f32 %v235_v29, %v231_v27  ;;  %v300_v32 = vsel %vm299_vm13, %v298_v24, %v281_v30 }
 0x161   :  { %v237_v34 = vmul.f32 0.9, %v236_v31 }
 0x163   :  { %v240_v35 = vadd.f32 %v238_v33, %v237_v34 }
 0x165   :  { %vm241_vm14 = vcmp.ge.f32.partialorder %v240_v35, 1.0 }
 0x166   :  { %v327_v36 = vsel %vm241_vm14, 1.0, %v491_v1 }
 0x167   :  { %v244_v37 = vsub.f32 1.0, %v327_v36  ;;  %v287_v38 = vrot.slane %v327_v36, %v543_v46 }
 0x169   :  { %v245_v39 = vmul.f32 %v244_v37, %v240_v35  ;;  %v302_v40 = vsel %vm301_vm15, %v300_v32, %v287_v38 }
 0x16a   :  { %303 = vst [vmem:[#allocation9] sm:$0xff] %v302_v40 }
 0x16b   :  { %246 = vst [vmem:[#allocation3] sm:$0x1] %v245_v39 }
 0x16c   :  { %468 = shalt.err (!%p465_p6)
}
 0x16d   :  { %s469_s10 = scalar_lea.hbm %s573_s2, 128 }
 0x16e   :  { %p470_p7 = scmp.ne.s32.totalorder %s573_s2, %s469_s10  ;;  %p473_p8 = scmp.lt.u32.totalorder %s469_s10, %s573_s2 }
 0x170   :  { %p475_p9 = pnand %p473_p8, %p470_p7 }
 0x172   :  { %478 = shalt.err (!%p475_p9)
}
 0x173   :  { %313 = dma.vmem_to_hbm [thread:$0]  %s311_s6, 128, %s573_s2, [#allocation6]  }
 0x174   :  { %483 = dma.done.wait [#allocation6], 128  }
 0x175   :  { %484 = vsyncadd [#allocation6], 4294967168 }
 0x176   :  { %317 = vsyncpa [#allocation5], 1 }
 0x177   :  { %318 = vsyncpa [#allocation8], 1 }
 0x178   :  { %319 = vsyncpa [#allocation6], 1 }

</bundles_post_ra>
